<compile_context>
chip_gen: v6e
topology: v6e:2x2x1
jax: 0.10.0
libtpu: 0.0.40
codegen_flags: <defaults>
</compile_context>

<pallas_src>
import functools

import jax
import jax.numpy as jnp
from jax.experimental import pallas as pl
from jax.experimental.pallas import tpu as pltpu


def adapter_stack_kernel(x_ref, m_ref, inv_ref, w_ref, b_ref, out_ref, num_acc,
                         *, f32_math):
    # x_ref:   [TB, TS, H]  hidden-state tile (bf16)
    # m_ref:   [TB, TS, 1]  attention-mask tile (bf16, values in {0,1})
    # inv_ref: [TB, 1]      precomputed 1/sum(mask) per example (f32, resident per B tile)
    # w_ref:   [H, C]       adapter weight (f32, resident)
    # b_ref:   [1, C]       adapter bias (f32, resident)
    # out_ref: [TB, C]      logits tile
    # num_acc: [TB, H] f32  masked-sum accumulator (VMEM scratch)
    si = pl.program_id(1)

    @pl.when(si == 0)
    def _init():
        num_acc[...] = jnp.zeros_like(num_acc)

    if f32_math:
        # v5e path: no bf16 VALU — upcast, multiply and accumulate in f32.
        x = x_ref[...].astype(jnp.float32)          # [TB, TS, H]
        m = m_ref[...].astype(jnp.float32)          # [TB, TS, 1]
        num_acc[...] += jnp.sum(m * x, axis=1)      # [TB, H]
    else:
        # v6e/v7x path: mask is {0,1} so the bf16 multiply is exact; only the
        # reduction accumulates in f32.  Halves the multiply vreg traffic and
        # drops the per-element upcast chain.
        num_acc[...] += jnp.sum(m_ref[...] * x_ref[...], axis=1,
                                dtype=jnp.float32)  # [TB, H]

    @pl.when(si == pl.num_programs(1) - 1)
    def _finalize():
        # NOTE: matches PyTorch semantics — an all-zero mask row yields Inf/NaN
        # (wrapper computes 1/0 = inf, so 0*inf = NaN / x*inf = Inf as before).
        pooled = num_acc[...] * inv_ref[...]                          # [TB, H]
        logits = jnp.dot(pooled, w_ref[...],
                         preferred_element_type=jnp.float32)          # [TB, C]
        logits = logits + b_ref[...]
        out_ref[...] = logits.astype(out_ref.dtype)


def _pick_tile(dim, cap, align):
    """Largest t <= cap with dim % t == 0 and (t % align == 0 or t == dim)."""
    if dim <= cap:
        return dim
    for t in range(cap, 0, -1):
        if dim % t == 0 and t % align == 0:
            return t
    return dim  # fallback: full extent (always legal: block == array dim)


def _round_up(v, m):
    return ((v + m - 1) // m) * m


def _vmem_bytes_estimate(TB, TS, H, C):
    """Conservative padded-layout VMEM working-set estimate (double-buffered)."""
    lane, sub = 128, 8
    x_buf   = 2 * TB * _round_up(TS, 16) * _round_up(H, lane) * 2    # bf16
    m_buf   = 2 * TB * _round_up(TS, 16) * lane * 2                  # last dim 1 -> lane padded
    inv_buf = 2 * _round_up(TB, sub) * lane * 4
    w_buf   = 2 * _round_up(H, sub) * _round_up(C, lane) * 4
    b_buf   = 2 * sub * _round_up(C, lane) * 4
    out_buf = 2 * _round_up(TB, sub) * _round_up(C, lane) * 4
    scratch = _round_up(TB, sub) * _round_up(H, lane) * 4
    return x_buf + m_buf + inv_buf + w_buf + b_buf + out_buf + scratch


def _needs_f32_math():
    """v5-class chips lack bf16 VALU; everywhere else the bf16 path is faster."""
    try:
        kind = jax.devices()[0].device_kind.lower()
    except Exception:  # no device info (e.g. interpret mode) -> bf16 path
        return False
    return "v5" in kind


def adapter_stack_forward(hidden_states, attention_mask, w, b):
    """hidden_states: [B, S, H] (any float dtype; cast to bf16 for HBM traffic),
       attention_mask: [B, S], w: [H, C], b: [C]  ->  logits [B, C] f32."""
    B, S, H = hidden_states.shape
    C = w.shape[1]

    # bf16 hidden states / mask in HBM: halves input bytes on a bandwidth-bound
    # kernel; accumulation stays f32 inside the kernel.
    x = hidden_states.astype(jnp.bfloat16)
    m = attention_mask.astype(jnp.bfloat16).reshape(B, S, 1)
    # Precomputed reciprocal denominator (B floats, trivial XLA op).  1/0 = inf
    # preserves the original Inf/NaN-on-empty-row behavior.
    inv_den = 1.0 / jnp.sum(attention_mask.astype(jnp.float32), axis=1,
                            keepdims=True)                            # [B, 1]
    w32 = w.astype(jnp.float32)
    b2 = b.astype(jnp.float32).reshape(1, C)

    # Tile sizes: TB<=8 (output sublane alignment; keeps B//TB even for the
    # megacore "parallel" axis at typical B), TS<=512.  At H=768 bf16 this is
    # ~6 MiB per x buffer -> ~12 MiB double-buffered: well inside v7x's 64 MiB
    # and big enough for ~85% of HBM roofline on v6e.  Do not enlarge on v7x —
    # that would shrink the per-core grid and expose the DMA warmup/epilogue.
    TB = _pick_tile(B, 8, 8)
    TS = _pick_tile(S, 512, 8)

    # VMEM-fit guard on the full-extent fallback: if S has no 8-aligned divisor
    # and is too large, zero-pad S to a 512-aligned length (padded mask rows are
    # zero, so the masked sums are unchanged).
    VMEM_BUDGET = 48 * 1024 * 1024
    if TS == S and _vmem_bytes_estimate(TB, TS, H, C) > VMEM_BUDGET:
        s_pad = _round_up(S, 512)
        pad = s_pad - S
        x = jnp.pad(x, ((0, 0), (0, pad), (0, 0)))
        m = jnp.pad(m, ((0, 0), (0, pad), (0, 0)))
        S, TS = s_pad, 512

    est = _vmem_bytes_estimate(TB, TS, H, C)
    assert est <= VMEM_BUDGET, (
        f"AdapterStack kernel tile working set ({est} B) exceeds VMEM budget; "
        f"reduce TS/TB for S={S}, H={H}")

    grid = (B // TB, S // TS)

    kernel = functools.partial(adapter_stack_kernel, f32_math=_needs_f32_math())

    # Advisory cost estimate so XLA schedules the surrounding graph around this
    # mem-bound custom call.
    cost = pl.CostEstimate(
        flops=3 * B * S * H + 2 * B * H * C,
        transcendentals=0,
        bytes_accessed=B * S * H * 2 + B * S * 2 + B * 4
                       + H * C * 4 + C * 4 + B * C * 4,
    )

    # TODO(synk): if attention masks are guaranteed contiguous prefixes, replace
    # the [B,S,1] mask tensor with scalar-prefetched lengths + in-register iota
    # mask and skip fully-padded S tiles; kept general here to match the module.
    return pl.pallas_call(
        kernel,
        out_shape=jax.ShapeDtypeStruct((B, C), jnp.float32),
        grid_spec=pltpu.PrefetchScalarGridSpec(
            num_scalar_prefetch=0,
            grid=grid,
            in_specs=[
                pl.BlockSpec((TB, TS, H), lambda bi, si: (bi, si, 0)),
                pl.BlockSpec((TB, TS, 1), lambda bi, si: (bi, si, 0)),
                # Per-example inverse denominator: one block per B tile.
                pl.BlockSpec((TB, 1), lambda bi, si: (bi, 0)),
                # Adapter weight/bias: same block for every grid point -> DMA'd
                # once and kept resident in VMEM.
                pl.BlockSpec((H, C), lambda bi, si: (0, 0)),
                pl.BlockSpec((1, C), lambda bi, si: (0, 0)),
            ],
            out_specs=pl.BlockSpec((TB, C), lambda bi, si: (bi, 0)),
            scratch_shapes=[
                pltpu.VMEM((TB, H), jnp.float32),   # masked-sum accumulator
            ],
        ),
        compiler_params=pltpu.CompilerParams(
            # B tiles are independent (megacore-shardable on v7x); S is the
            # reduction axis and must stay sequential (last grid axis).
            dimension_semantics=("parallel", "arbitrary"),
            # Right-sized to the working set + headroom (also covers v5e, whose
            # 16 MiB scoped default would be too small for the real config).
            vmem_limit_bytes=min(max(int(est) + (8 << 20), 16 << 20), 64 << 20),
        ),
        cost_estimate=cost,
    )(x, m, inv_den, w32, b2)


def reference_forward(hidden_states, attention_mask, w, b):
    m3 = attention_mask[:, :, None]
    pooled = jnp.sum(m3 * hidden_states, axis=-2) / jnp.sum(
        attention_mask, axis=1, keepdims=True)
    return pooled @ w + b[None, :]


if __name__ == "__main__":
    # Small shapes consistent with the forward: batch=2, seq=8, hidden=32,
    # adapter output classes=4.
    B, S, H, C = 2, 8, 32, 4

    key = jax.random.PRNGKey(0)
    k_x, k_w, k_b = jax.random.split(key, 3)

    # TODO(synk): the real base_model (DNABERT-S transformer) is external; we
    # synthesize its hidden-state output deterministically here.
    hidden_states = jax.random.normal(k_x, (B, S, H), dtype=jnp.float32)

    # attention mask: first 6 tokens valid in batch 0, first 5 in batch 1
    attention_mask = jnp.array(
        [[1, 1, 1, 1, 1, 1, 0, 0],
         [1, 1, 1, 1, 1, 0, 0, 0]], dtype=jnp.float32)

    # adapter = Linear(H, C), deterministic init
    w = jax.random.normal(k_w, (H, C), dtype=jnp.float32) * 0.02
    b = jax.random.normal(k_b, (C,), dtype=jnp.float32) * 0.02

    out = adapter_stack_forward(hidden_states, attention_mask, w, b)
    out = jax.block_until_ready(out)

    # Reference uses the same bf16-quantized hidden states the kernel sees so
    # the comparison isolates kernel arithmetic, not the bf16 storage choice.
    hs_bf16 = hidden_states.astype(jnp.bfloat16).astype(jnp.float32)
    ref = reference_forward(hs_bf16, attention_mask, w, b)

    assert out.shape == (B, C)
    assert jnp.allclose(out, ref, atol=1e-4, rtol=1e-4), "mismatch vs reference"

    print("KERNEL_OK")
</pallas_src>

<mosaic_0001>
module attributes {stable_mosaic.version = 11 : i64} {
  func.func @adapter_stack_kernel(%arg0: i32, %arg1: i32, %arg2: memref<2x8x32xbf16, #tpu.memory_space<vmem>>, %arg3: memref<2x8x1xbf16, #tpu.memory_space<vmem>>, %arg4: memref<2x1xf32, #tpu.memory_space<vmem>>, %arg5: memref<32x4xf32, #tpu.memory_space<vmem>>, %arg6: memref<1x4xf32, #tpu.memory_space<vmem>>, %arg7: memref<2x4xf32, #tpu.memory_space<vmem>>, %arg8: memref<2x32xf32, #tpu.memory_space<vmem>>) attributes {dimension_semantics = [#tpu.dimension_semantics<parallel>, #tpu.dimension_semantics<arbitrary>], iteration_bounds = array<i64: 1, 1>, scalar_prefetch = 0 : i64, scratch_operands = 1 : i64, tpu.core_type = #tpu.core_type<tc>, window_params = [{transform_indices = @transform_0, window_bounds = array<i64: 2, 8, 32>}, {transform_indices = @transform_1, window_bounds = array<i64: 2, 8, 1>}, {transform_indices = @transform_2, window_bounds = array<i64: 2, 1>}, {pipeline_mode = #tpu.pipeline_mode<synchronous>, transform_indices = @transform_3, window_bounds = array<i64: 32, 4>}, {pipeline_mode = #tpu.pipeline_mode<synchronous>, transform_indices = @transform_4, window_bounds = array<i64: 1, 4>}, {transform_indices = @transform_5, window_bounds = array<i64: 2, 4>}]} {
    %c0_i32 = arith.constant 0 : i32
    %0 = arith.cmpi eq, %arg1, %c0_i32 : i32
    %1 = arith.extui %0 : i1 to i32
    %c0_i32_0 = arith.constant 0 : i32
    %2 = arith.cmpi ne, %1, %c0_i32_0 : i32
    scf.if %2 {
      %cst_12 = arith.constant 0.000000e+00 : f32
      %15 = vector.broadcast %cst_12 : f32 to vector<2x32xf32>
      %c0_13 = arith.constant 0 : index
      %c0_14 = arith.constant 0 : index
      %16 = vector.load %arg8[%c0_13, %c0_14] : memref<2x32xf32, #tpu.memory_space<vmem>>, vector<2x32xf32>
      tpu.vector_store %arg8[%c0_13, %c0_14], %15 {strides = array<i32>} : memref<2x32xf32, #tpu.memory_space<vmem>>, vector<2x32xf32>,
    } else {
    }
    %c0 = arith.constant 0 : index
    %c0_1 = arith.constant 0 : index
    %3 = vector.load %arg8[%c0, %c0_1] : memref<2x32xf32, #tpu.memory_space<vmem>>, vector<2x32xf32>
    %c0_2 = arith.constant 0 : index
    %c0_3 = arith.constant 0 : index
    %c0_4 = arith.constant 0 : index
    %4 = vector.load %arg3[%c0_2, %c0_3, %c0_4] : memref<2x8x1xbf16, #tpu.memory_space<vmem>>, vector<2x8x1xbf16>
    %c0_5 = arith.constant 0 : index
    %c0_6 = arith.constant 0 : index
    %c0_7 = arith.constant 0 : index
    %5 = vector.load %arg2[%c0_5, %c0_6, %c0_7] : memref<2x8x32xbf16, #tpu.memory_space<vmem>>, vector<2x8x32xbf16>
    %6 = vector.broadcast %4 : vector<2x8x1xbf16> to vector<2x8x32xbf16>
    %7 = arith.mulf %6, %5 : vector<2x8x32xbf16>
    %8 = arith.extf %7 : vector<2x8x32xbf16> to vector<2x8x32xf32>
    %cst = arith.constant dense<0.000000e+00> : vector<2x32xf32>
    %9 = vector.multi_reduction <add>, %8, %cst [1] : vector<2x8x32xf32> to vector<2x32xf32>
    %10 = arith.addf %3, %9 : vector<2x32xf32>
    %c0_8 = arith.constant 0 : index
    %c0_9 = arith.constant 0 : index
    %11 = vector.load %arg8[%c0_8, %c0_9] : memref<2x32xf32, #tpu.memory_space<vmem>>, vector<2x32xf32>
    tpu.vector_store %arg8[%c0_8, %c0_9], %10 {strides = array<i32>} : memref<2x32xf32, #tpu.memory_space<vmem>>, vector<2x32xf32>,
    %c0_i32_10 = arith.constant 0 : i32
    %12 = arith.cmpi eq, %arg1, %c0_i32_10 : i32
    %13 = arith.extui %12 : i1 to i32
    %c0_i32_11 = arith.constant 0 : i32
    %14 = arith.cmpi ne, %13, %c0_i32_11 : i32
    scf.if %14 {
      %c0_12 = arith.constant 0 : index
      %c0_13 = arith.constant 0 : index
      %15 = vector.load %arg8[%c0_12, %c0_13] : memref<2x32xf32, #tpu.memory_space<vmem>>, vector<2x32xf32>
      %c0_14 = arith.constant 0 : index
      %c0_15 = arith.constant 0 : index
      %16 = vector.load %arg4[%c0_14, %c0_15] : memref<2x1xf32, #tpu.memory_space<vmem>>, vector<2x1xf32>
      %17 = vector.broadcast %16 : vector<2x1xf32> to vector<2x32xf32>
      %18 = arith.mulf %15, %17 : vector<2x32xf32>
      %c0_16 = arith.constant 0 : index
      %c0_17 = arith.constant 0 : index
      %19 = vector.load %arg5[%c0_16, %c0_17] : memref<32x4xf32, #tpu.memory_space<vmem>>, vector<32x4xf32>
      %cst_18 = arith.constant dense<0.000000e+00> : vector<2x4xf32>
      %20 = tpu.matmul %18, %19, %cst_18 {dimension_numbers = #tpu.dot_dimension_numbers<[1], [0], [0], [1], [0, 0, 1, 1], [], []>} : vector<2x32xf32>, vector<32x4xf32>, vector<2x4xf32> -> vector<2x4xf32>
      %c0_19 = arith.constant 0 : index
      %c0_20 = arith.constant 0 : index
      %21 = vector.load %arg6[%c0_19, %c0_20] : memref<1x4xf32, #tpu.memory_space<vmem>>, vector<1x4xf32>
      %22 = vector.broadcast %21 : vector<1x4xf32> to vector<2x4xf32>
      %23 = arith.addf %20, %22 : vector<2x4xf32>
      %c0_21 = arith.constant 0 : index
      %c0_22 = arith.constant 0 : index
      %24 = vector.load %arg7[%c0_21, %c0_22] : memref<2x4xf32, #tpu.memory_space<vmem>>, vector<2x4xf32>
      tpu.vector_store %arg7[%c0_21, %c0_22], %23 {strides = array<i32>} : memref<2x4xf32, #tpu.memory_space<vmem>>, vector<2x4xf32>,
    } else {
    }
    return
  }
  func.func @transform_0(%arg0: i32, %arg1: i32) -> (i32, i32, i32) {
    %c0_i32 = arith.constant 0 : i32
    %c0_i32_0 = arith.constant 0 : i32
    return %arg0, %arg1, %c0_i32 : i32, i32, i32
  }
  func.func @transform_1(%arg0: i32, %arg1: i32) -> (i32, i32, i32) {
    %c0_i32 = arith.constant 0 : i32
    %c0_i32_0 = arith.constant 0 : i32
    return %arg0, %arg1, %c0_i32 : i32, i32, i32
  }
  func.func @transform_2(%arg0: i32, %arg1: i32) -> (i32, i32) {
    %c0_i32 = arith.constant 0 : i32
    %c0_i32_0 = arith.constant 0 : i32
    return %arg0, %c0_i32 : i32, i32
  }
  func.func @transform_3(%arg0: i32, %arg1: i32) -> (i32, i32) {
    %c0_i32 = arith.constant 0 : i32
    %c0_i32_0 = arith.constant 0 : i32
    %c0_i32_1 = arith.constant 0 : i32
    return %c0_i32, %c0_i32_0 : i32, i32
  }
  func.func @transform_4(%arg0: i32, %arg1: i32) -> (i32, i32) {
    %c0_i32 = arith.constant 0 : i32
    %c0_i32_0 = arith.constant 0 : i32
    %c0_i32_1 = arith.constant 0 : i32
    return %c0_i32, %c0_i32_0 : i32, i32
  }
  func.func @transform_5(%arg0: i32, %arg1: i32) -> (i32, i32) {
    %c0_i32 = arith.constant 0 : i32
    %c0_i32_0 = arith.constant 0 : i32
    return %arg0, %c0_i32 : i32, i32
  }
}

</mosaic_0001>

<bundles_post_ra>
// kernel: tpu_custom_call.1
= control target key start
LH: loop header
LB: loop body
LE: loop exit
PB: predicated region body
PF: predicated region fallthrough
CT: control target
= control target key end

     0   :  { %v241_v1 = vmov 0   ;;  %s314_s0 = inlined_call_operand.vmem [shape: bf16[2,8,32], index: 0, kind: input, shape index: {}]   ;;  %s315_s1 = inlined_call_operand.vmem [shape: bf16[2,8,1], index: 1, kind: input, shape index: {}]   ;;  %s316_s2 = inlined_call_operand.vmem [shape: f32[2,1], index: 2, kind: input, shape index: {}]   ;;  %s317_s3 = inlined_call_operand.vmem [shape: f32[32,4], index: 3, kind: input, shape index: {}]   ;;  %s318_s4 = inlined_call_operand.vmem [shape: f32[1,4], index: 4, kind: input, shape index: {}]   ;;  %s319_s5 = inlined_call_operand.hbm [shape: f32[2,4], index: 5, kind: output, shape index: {}]  }
   0x1   :  { %v28_v0 = vld [vmem:[%s315_s1] sm:$0xf]  ;;  %217 = vset.pattern.permute.xlu0 %v241_v1  ;;  %218 = vset.pattern.permute.xlu1 %v241_v1 }
   0x2   :  { %v87_v2 = vld [vmem:[%s316_s2] sm:$0x3]  ;;  %34 = vperm.xlu0 %217, %v28_v0  }
   0x3   :  { %90 = vperm.xlu1 %218, %v87_v2  }
   0x4   :  { %10 = vsyncpa [#allocation4], 0  ;;  %v29_v3 = vld [vmem:[%s315_s1 + $0x4] sm:$0xf]  ;;  %vm25_vm0 = vcmask 254976   ;;  %v97_v4 = vld [vmem:[%s317_s3 + $0x18] sm:$0xff]  ;;  %v40_v11 = vlaneseq }
   0x5   :  { %v242_v5 = vmov 0.0   ;;  %v96_v6 = vld [vmem:[%s317_s3 + $0x10] sm:$0xff]  ;;  %v95_v7 = vld [vmem:[%s317_s3 + $0x8] sm:$0xff]  ;;  %v94_v8 = vld [vmem:[%s317_s3] sm:$0xff]  ;;  %vm243_vm1 = vmmov 0   ;;  %vm60_vm2 = vcmask 261120  }
   0x6   :  { %46 = vperm.xlu0 %217, %v29_v3   ;;  %26 = vst.msk [vmem:[#allocation2] sm:$0x3] %vm25_vm0, %v242_v5  ;;  %201 = vmatprep.subr.mxu0 %v242_v5  ;;  %v244_v9 = vmov 839922192   ;;  %v41_v13 = vshrl.u32 %v40_v11, 7  ;;  %vm77_vm3 = vcmask 1041409  }
   0x7   :  { %202 = vmatpush3.msra.mxu0 %v97_v4  ;;  %209 = vmatprep.mubr.msk.f32.mxu0 %vm243_vm1, %v242_v5  ;;  %v38_v10 = vunpack.c.l.s4 %v244_v9  ;;  %v30_v15 = vld [vmem:[%s314_s0] sm:$0xf]  ;;  %v31_v19 = vld [vmem:[%s314_s0 + $0x4] sm:$0xf]  ;;  %s245_s9 = smov [#allocation3]   ;;  %vm178_vm4 = vcmask 25600  }
   0x8   :  { %203 = vmatprep.subr.mxu0 %v242_v5  ;;  %v194_v45 = vld [vmem:[%s318_s4] ss:$0 sm:$0xff]  ;;  %s186_s10 = sshll.u32 %s245_s9, 4  ;;  %s187_s10 = int_to_ptr.vmem [resolvable:$true] %s186_s10 }
   0x9   :  { %204 = vmatpush3.msra.mxu0 %v96_v6  ;;  %v39_v12 = vunpack.c.0.s8 %v38_v10  ;;  %s219_s11 = scalar_lea.vmem %s187_s10, 32  ;;  %p224_p1 = scmp.lt.s32.totalorder %s187_s10, %s187_s10 }
   0xa   :  { %205 = vmatprep.subr.mxu0 %v242_v5  ;;  %p220_p0 = scmp.ne.s32.totalorder %s187_s10, %s219_s11  ;;  %p225_p2 = scmp.lt.s32.totalorder %s219_s11, %s219_s11 }
   0xb   :  { %206 = vmatpush3.msra.mxu0 %v95_v7  ;;  %v42_v14 = vsub.s32 %v39_v12, %v41_v13 }
   0xc   :  { %207 = vmatprep.subr.mxu0 %v242_v5  ;;  %p226_p3 = por %p225_p2, %p224_p1 }
   0xd   :  { %208 = vmatpush3.msra.mxu0 %v94_v8  ;;  %v27_v37 = vld [vmem:[#allocation2] sm:$0x3] }
   0xe   :  { %p227_p4 = pnand %p226_p3, %p220_p0 }
  0x7d   :  { %v35_v16 = vpop.permute.xlu0 %34 }
  0x7e   :  { %v43_v17 = vrot.slane %v35_v16, %v42_v14  ;;  %v91_v42 = vpop.permute.xlu1 %90 }
  0x80   :  { %v56_v18 = vmul.bf16 %v43_v17, %v30_v15 }
  0x81   :  { %v47_v20 = vpop.permute.xlu0 %46 }
  0x82   :  { %v58_v21 = vunpack.c.l.bf16 %v56_v18  ;;  %v55_v22 = vrot.slane %v47_v20, %v42_v14 }
  0x84   :  { %v57_v23 = vmul.bf16 %v55_v22, %v31_v19  ;;  %v61_v24 = vsel %vm60_vm2, %v58_v21, 0.0 }
  0x85   :  { %v62_v25 = vrot.slane %v61_v24, 4 }
  0x86   :  { %v59_v26 = vunpack.c.l.bf16 %v57_v23 }
  0x87   :  { %v63_v27 = vadd.f32 %v62_v25, %v61_v24 }
  0x88   :  { %v68_v28 = vsel %vm60_vm2, %v59_v26, 0.0 }
  0x89   :  { %v64_v29 = vrot.slane %v63_v27, 2  ;;  %v69_v30 = vrot.slane %v68_v28, 4 }
  0x8b   :  { %v65_v31 = vadd.f32 %v64_v29, %v63_v27  ;;  %v70_v32 = vadd.f32 %v69_v30, %v68_v28 }
  0x8d   :  { %v71_v33 = vrot.slane %v70_v32, 2  ;;  %v66_v34 = vrot.slane %v65_v31, 1 }
  0x8f   :  { %v72_v35 = vadd.f32 %v71_v33, %v70_v32  ;;  %v67_v38 = vadd.f32 %v66_v34, %v65_v31 }
  0x91   :  { %v73_v36 = vrot.slane %v72_v35, 1 }
  0x93   :  { %v74_v39 = vadd.f32 %v73_v36, %v72_v35 }
  0x95   :  { %v78_v40 = vsel %vm77_vm3, %v74_v39, %v67_v38 }
  0x96   :  { %v80_v41 = vadd.f32 %v78_v40, %v27_v37 }
  0x98   :  { %82 = vst.msk [vmem:[#allocation2] sm:$0x3] %vm25_vm0, %v80_v41 }
  0x9f   :  { %v86_v43 = vld [vmem:[#allocation2] sm:$0x3] }
  0xa0   :  { %v93_v44 = vmul.f32 %v91_v42, %v86_v43 }
  0xa2   :  { %210 = vmatmul.mubr.msk.f32.vlgmr.msra.gmra.mxu0 %vm60_vm2, %v93_v44 }
 0x162   :  { %v174_v46 = vpop.f32.mrf.mxu0 }
 0x163   :  { %v175_v47 = vadd.f32 %v194_v45, %v174_v46 }
 0x164   :  { %v211_v48 = vpop.f32.mrf.mxu0 }
 0x165   :  { %179 = vst.msk [vmem:[#allocation3] sm:$0x3] %vm178_vm4, %v175_v47 }
 0x166   :  { %230 = shalt.err (!%p227_p4)
}
 0x167   :  { %189 = dma.vmem_to_hbm [thread:$0]  %s187_s10, 32, %s319_s5, [#allocation4]  }
 0x168   :  { %239 = dma.done.wait [#allocation4], 32  }
 0x169   :  { %240 = vsyncadd [#allocation4], 4294967264 }
 0x16a   :  { %193 = vsyncpa [#allocation4], 1 }

</bundles_post_ra>
